<compile_context>
chip_gen: v7x
topology: tpu7x:2x2x1
jax: 0.10.0
libtpu: 0.0.40
codegen_flags: <defaults>
</compile_context>

<pallas_src>
import functools

import jax
import jax.numpy as jnp
from jax.experimental import pallas as pl
from jax.experimental.pallas import tpu as pltpu


# ---- binary op registry (the "fn" passed to BinaryModule) -------------------
_BINARY_FNS = {
    "add": lambda a, b: a + b,
    "sub": lambda a, b: a - b,
    "mul": lambda a, b: a * b,
    "div": lambda a, b: a / b,   # jnp '/' is true-divide (matches torch.div)
}

_LANES = 128
_MIN_BLOCK_BYTES = 2 * 1024 * 1024   # never shrink a tile below ~2 MiB


def _round_up(x, m):
    return ((x + m - 1) // m) * m


def _binary_kernel(a_ref, b_ref, o_ref, *, op_name, out_dtype):
    # dtype promotion + (scalar) broadcast fused here; VPU slots are free in
    # this vld/vst-bound kernel.
    a = a_ref[...].astype(out_dtype)
    b = b_ref[...].astype(out_dtype)
    o_ref[...] = _BINARY_FNS[op_name](a, b)


def _vmem_capacity_bytes():
    """Trace-time chip query; conservative (v7x: 64 MiB/TC) fallback."""
    try:
        info = pltpu.get_tpu_info()
        cap = getattr(info, "vmem_capacity_bytes", None)
        if cap:
            return int(cap)
    except Exception:
        pass
    return 64 * 1024 * 1024


def binary_module_forward(a, b, *, fn="add"):
    """Pallas implementation of BinaryModule(fn).forward(a, b)."""
    fn_jnp = _BINARY_FNS[fn]
    a = jnp.asarray(a)
    b = jnp.asarray(b)

    out_shape = jnp.broadcast_shapes(a.shape, b.shape)
    out_dtype = jax.eval_shape(
        fn_jnp,
        jax.ShapeDtypeStruct((), a.dtype),
        jax.ShapeDtypeStruct((), b.dtype),
    ).dtype

    a_scalar = a.size == 1
    b_scalar = b.size == 1

    # General (non-scalar) broadcasting: let XLA fuse the broadcast into its
    # own elementwise op instead of writing a full-size broadcast copy to HBM
    # just to feed the kernel.
    # TODO(synk): fuse bias-style (C,1,1) broadcasts into the kernel too.
    if a.shape != b.shape and not (a_scalar or b_scalar):
        return fn_jnp(a, b)

    n = 1
    for d in out_shape:
        n *= int(d)

    # dtype-aware sublane alignment (bf16 packs 16 rows per vreg, int8/fp8 32)
    tiled_dtypes = [out_dtype]
    if not a_scalar:
        tiled_dtypes.append(a.dtype)
    if not b_scalar:
        tiled_dtypes.append(b.dtype)
    itemsizes = [jnp.dtype(d).itemsize for d in tiled_dtypes]
    min_itemsize = min(itemsizes)
    max_itemsize = max(itemsizes)
    sub_align = 8 * max(1, 4 // min_itemsize)
    min_kernel_elems = sub_align * _LANES

    # Tiny tensors (or scalar-op-scalar): XLA's fused op beats a kernel launch.
    if n < min_kernel_elems or (a_scalar and b_scalar):
        return fn_jnp(a, b)

    # Lane-aligned main slab + (<128-elem) jnp tail — no full-array pad/slice
    # HBM passes on the hot path.
    n_main = (n // _LANES) * _LANES
    rows = n_main // _LANES
    tail = n - n_main

    a_flat = None if a_scalar else a.reshape(-1)
    b_flat = None if b_scalar else b.reshape(-1)

    # --- generation-aware tile sizing ---------------------------------------
    vmem_cap = _vmem_capacity_bytes()
    big_vmem = vmem_cap >= 96 * 1024 * 1024            # v5e/v6e (128 MiB) vs v7x (64 MiB)
    live_budget = (48 if big_vmem else 24) * 1024 * 1024
    vmem_cap_limit = (64 if big_vmem else 32) * 1024 * 1024

    bytes_per_row = _LANES * sum(itemsizes)            # all double-buffered tiled operands
    tr_default = max(sub_align,
                     (live_budget // (2 * bytes_per_row)) // sub_align * sub_align)

    if rows <= tr_default:
        tr = rows                                       # single block == full array dims
    else:
        tr = tr_default
    num_blocks = pl.cdiv(rows, tr)

    # Megacore / pipelining: aim for >= 4 blocks (2 per TensorCore on v7x) as
    # long as each block stays >= ~2 MiB.
    if num_blocks < 4:
        tr_cand = _round_up(pl.cdiv(rows, 4), sub_align)
        if tr_cand < rows and tr_cand * _LANES * max_itemsize >= _MIN_BLOCK_BYTES:
            tr = tr_cand
            num_blocks = pl.cdiv(rows, tr)

    live_bytes = 2 * tr * bytes_per_row
    vmem_limit = int(min(vmem_cap_limit,
                         max(16 * 1024 * 1024, (live_bytes * 5) // 4)))

    # --- operands & specs ----------------------------------------------------
    operands = []
    in_specs = []
    if a_scalar:
        operands.append(a.reshape(1, 1))
        in_specs.append(pl.BlockSpec((1, 1), lambda i: (0, 0)))
    else:
        a_main = a_flat if tail == 0 else a_flat[:n_main]
        operands.append(a_main.reshape(rows, _LANES))
        in_specs.append(pl.BlockSpec((tr, _LANES), lambda i: (i, 0)))
    if b_scalar:
        operands.append(b.reshape(1, 1))
        in_specs.append(pl.BlockSpec((1, 1), lambda i: (0, 0)))
    else:
        b_main = b_flat if tail == 0 else b_flat[:n_main]
        operands.append(b_main.reshape(rows, _LANES))
        in_specs.append(pl.BlockSpec((tr, _LANES), lambda i: (i, 0)))

    kernel = functools.partial(_binary_kernel, op_name=fn, out_dtype=out_dtype)

    out_main = pl.pallas_call(
        kernel,
        out_shape=jax.ShapeDtypeStruct((rows, _LANES), out_dtype),
        grid=(num_blocks,),
        in_specs=in_specs,
        out_specs=pl.BlockSpec((tr, _LANES), lambda i: (i, 0)),
        compiler_params=pltpu.CompilerParams(
            dimension_semantics=("parallel",),
            vmem_limit_bytes=vmem_limit,
        ),
        cost_estimate=pl.CostEstimate(
            flops=rows * _LANES,
            transcendentals=0,
            bytes_accessed=rows * _LANES * sum(itemsizes),
        ),
    )(*operands)

    out_flat = out_main.reshape(-1)
    if tail:
        a_tail = a.reshape(()) if a_scalar else a_flat[n_main:]
        b_tail = b.reshape(()) if b_scalar else b_flat[n_main:]
        out_tail = fn_jnp(a_tail, b_tail).astype(out_dtype).reshape(-1)
        out_flat = jnp.concatenate([out_flat, out_tail])
    return out_flat.reshape(out_shape)


if __name__ == "__main__":
    key = jax.random.PRNGKey(0)
    failures = []

    def run_case(tag, a, b, ops=("add", "sub", "mul", "div"), tol=1e-5):
        for op_name in ops:
            out = jax.block_until_ready(binary_module_forward(a, b, fn=op_name))
            ref = _BINARY_FNS[op_name](a, b)
            if out.shape != ref.shape or out.dtype != ref.dtype:
                failures.append(
                    f"{tag}/{op_name}: shape/dtype {out.shape}{out.dtype} "
                    f"vs {ref.shape}{ref.dtype}")
                continue
            if not jnp.allclose(out.astype(jnp.float32), ref.astype(jnp.float32),
                                atol=tol, rtol=tol):
                failures.append(f"{tag}/{op_name}: value mismatch")

    # same-shape f32 (lane-aligned fast path)
    key, ka, kb = jax.random.split(key, 3)
    a32 = jax.random.normal(ka, (2, 4, 16, 16), dtype=jnp.float32)
    b32 = jax.random.normal(kb, (2, 4, 16, 16), dtype=jnp.float32) + 2.0
    run_case("f32_aligned", a32, b32)

    # bf16 (dtype-aware 16-row sublane alignment)
    run_case("bf16_aligned", a32.astype(jnp.bfloat16), b32.astype(jnp.bfloat16),
             tol=2e-2)

    # mixed dtype: promotion fused in-kernel
    run_case("mixed_f32_bf16", a32, b32.astype(jnp.bfloat16), tol=2e-2)

    # scalar operands fused into the kernel (no broadcast copy in HBM)
    run_case("scalar_rhs", a32, jnp.asarray(2.5, dtype=jnp.float32))
    run_case("scalar_lhs", jnp.asarray(3.0, dtype=jnp.float32), b32)

    # ragged size (n % 128 != 0): aligned prefix in the kernel + jnp tail
    key, ka, kb = jax.random.split(key, 3)
    ar = jax.random.normal(ka, (3, 5, 7, 11), dtype=jnp.float32)
    br = jax.random.normal(kb, (3, 5, 7, 11), dtype=jnp.float32) + 2.0
    run_case("f32_ragged", ar, br)

    # tiny input: jnp short-circuit
    key, ka, kb = jax.random.split(key, 3)
    at = jax.random.normal(ka, (1, 2, 3, 4), dtype=jnp.float32)
    bt = jax.random.normal(kb, (1, 2, 3, 4), dtype=jnp.float32) + 2.0
    run_case("tiny", at, bt)

    # general (bias-style) broadcast: XLA-fused fallback
    key, kc = jax.random.split(key)
    bias = jax.random.normal(kc, (4, 1, 1), dtype=jnp.float32) + 2.0
    run_case("bias_broadcast_fallback", a32, bias)

    if failures:
        for f in failures:
            print("MISMATCH:", f)
    else:
        print("KERNEL_OK")
</pallas_src>

<mosaic_0001>
module attributes {stable_mosaic.version = 11 : i64} {
  func.func @_binary_kernel(%arg0: i32, %arg1: memref<16x128xf32, #tpu.memory_space<vmem>>, %arg2: memref<16x128xf32, #tpu.memory_space<vmem>>, %arg3: memref<16x128xf32, #tpu.memory_space<vmem>>) attributes {dimension_semantics = [#tpu.dimension_semantics<parallel>], iteration_bounds = array<i64: 1>, scalar_prefetch = 0 : i64, scratch_operands = 0 : i64, tpu.core_type = #tpu.core_type<tc>, window_params = [{transform_indices = @transform_0, window_bounds = array<i64: 16, 128>}, {transform_indices = @transform_1, window_bounds = array<i64: 16, 128>}, {transform_indices = @transform_2, window_bounds = array<i64: 16, 128>}]} {
    %c0 = arith.constant 0 : index
    %c0_0 = arith.constant 0 : index
    %0 = vector.load %arg1[%c0, %c0_0] : memref<16x128xf32, #tpu.memory_space<vmem>>, vector<16x128xf32>
    %c0_1 = arith.constant 0 : index
    %c0_2 = arith.constant 0 : index
    %1 = vector.load %arg2[%c0_1, %c0_2] : memref<16x128xf32, #tpu.memory_space<vmem>>, vector<16x128xf32>
    %2 = arith.addf %0, %1 : vector<16x128xf32>
    %c0_3 = arith.constant 0 : index
    %c0_4 = arith.constant 0 : index
    %3 = vector.load %arg3[%c0_3, %c0_4] : memref<16x128xf32, #tpu.memory_space<vmem>>, vector<16x128xf32>
    tpu.vector_store %arg3[%c0_3, %c0_4], %2 {strides = array<i32>} : memref<16x128xf32, #tpu.memory_space<vmem>>, vector<16x128xf32>,
    return
  }
  func.func @transform_0(%arg0: i32) -> (i32, i32) {
    %c0_i32 = arith.constant 0 : i32
    %c0_i32_0 = arith.constant 0 : i32
    return %arg0, %c0_i32 : i32, i32
  }
  func.func @transform_1(%arg0: i32) -> (i32, i32) {
    %c0_i32 = arith.constant 0 : i32
    %c0_i32_0 = arith.constant 0 : i32
    return %arg0, %c0_i32 : i32, i32
  }
  func.func @transform_2(%arg0: i32) -> (i32, i32) {
    %c0_i32 = arith.constant 0 : i32
    %c0_i32_0 = arith.constant 0 : i32
    return %arg0, %c0_i32 : i32, i32
  }
}

</mosaic_0001>

<bundles_post_ra>
// kernel: tpu_custom_call.1
= control target key start
LH: loop header
LB: loop body
LE: loop exit
PB: predicated region body
PF: predicated region fallthrough
CT: control target
= control target key end

     0   :  { %7 = vsyncpa [#allocation3], 0  ;;  %s208_s0 = inlined_call_operand.hbm [shape: f32[16,128], index: 0, kind: input, shape index: {}]   ;;  %s209_s1 = inlined_call_operand.hbm [shape: f32[16,128], index: 1, kind: input, shape index: {}]   ;;  %s210_s2 = inlined_call_operand.hbm [shape: f32[16,128], index: 2, kind: output, shape index: {}]  }
   0x1   :  { %8 = vsyncpa [#allocation6], 0 }
   0x2   :  { %9 = vsyncpa [#allocation4], 0  ;;  %s143_s9 = smov [#allocation2]   ;;  %s71_s13 = scalar_lea.hbm %s208_s0, 256 }
   0x3   :  { %s15_s10 = sshll.u32 %s143_s9, 4  ;;  %p72_p0 = scmp.ne.s32.totalorder %s208_s0, %s71_s13  ;;  %s16_s10 = int_to_ptr.vmem [resolvable:$true] %s15_s10 }
   0x4   :  { %p75_p1 = scmp.lt.u32.totalorder %s71_s13, %s208_s0 }
   0x6   :  { %p77_p2 = pnand %p75_p1, %p72_p0 }
   0x8   :  { %80 = shalt.err (!%p77_p2)
}
   0x9   :  { %s81_s18 = scalar_lea.vmem %s16_s10, 256  ;;  %p86_p4 = scmp.lt.s32.totalorder %s16_s10, %s16_s10 }
   0xa   :  { %p82_p3 = scmp.ne.s32.totalorder %s16_s10, %s81_s18  ;;  %p87_p5 = scmp.lt.s32.totalorder %s81_s18, %s81_s18 }
   0xc   :  { %p88_p6 = por %p87_p5, %p86_p4 }
   0xe   :  { %p89_p7 = pnand %p88_p6, %p82_p3 }
  0x10   :  { %92 = shalt.err (!%p89_p7)
}
  0x11   :  { %s144_s19 = smov 128   ;;  %s145_s20 = smov 8  }
  0x12   :  { %21 = dma.hbm_to_vmem [thread:$0]  %s208_s0, 256, %s16_s10, [#allocation3], %s144_s19, %s144_s19, %s145_s20  }
  0x13   :  { %s146_s23 = smov [#allocation5]   ;;  %s93_s27 = scalar_lea.hbm %s209_s1, 256 }
  0x14   :  { %s27_s24 = sshll.u32 %s146_s23, 4  ;;  %p94_p8 = scmp.ne.s32.totalorder %s209_s1, %s93_s27  ;;  %s28_s24 = int_to_ptr.vmem [resolvable:$true] %s27_s24 }
  0x15   :  { %p97_p9 = scmp.lt.u32.totalorder %s93_s27, %s209_s1 }
  0x17   :  { %p99_p10 = pnand %p97_p9, %p94_p8 }
  0x19   :  { %102 = shalt.err (!%p99_p10)
}
  0x1a   :  { %s103_s4 = scalar_lea.vmem %s28_s24, 256  ;;  %p108_p12 = scmp.lt.s32.totalorder %s28_s24, %s28_s24 }
  0x1b   :  { %p104_p11 = scmp.ne.s32.totalorder %s28_s24, %s103_s4  ;;  %p109_p13 = scmp.lt.s32.totalorder %s103_s4, %s103_s4 }
  0x1d   :  { %p110_p0 = por %p109_p13, %p108_p12 }
  0x1f   :  { %p111_p1 = pnand %p110_p0, %p104_p11 }
  0x21   :  { %114 = shalt.err (!%p111_p1)
}
  0x22   :  { %33 = dma.hbm_to_vmem [thread:$0]  %s209_s1, 256, %s28_s24, [#allocation6], %s144_s19, %s144_s19, %s145_s20  }
  0x23   :  { %137 = dma.done.wait [#allocation3], 256  }
  0x24   :  { %138 = vsyncadd [#allocation3], 4294967040 }
  0x25   :  { %139 = dma.done.wait [#allocation6], 256  }
  0x26   :  { %140 = vsyncadd [#allocation6], 4294967040  ;;  %s147_s6 = smov [#allocation7]   ;;  %v40_v0 = vld [vmem:[#allocation2] sm:$0xff]  ;;  %v42_v1 = vld [vmem:[#allocation5] sm:$0xff] }
  0x27   :  { %s53_s7 = sshll.u32 %s147_s6, 4  ;;  %v41_v2 = vld [vmem:[#allocation2 + $0x8] sm:$0xff]  ;;  %v44_v3 = vadd.f32 %v42_v1, %v40_v0  ;;  %v43_v4 = vld [vmem:[#allocation5 + $0x8] sm:$0xff]  ;;  %s54_s7 = int_to_ptr.vmem [resolvable:$true] %s53_s7 }
  0x28   :  { %v45_v5 = vadd.f32 %v43_v4, %v41_v2  ;;  %s115_s8 = scalar_lea.vmem %s54_s7, 256  ;;  %p120_p3 = scmp.lt.s32.totalorder %s54_s7, %s54_s7 }
  0x29   :  { %46 = vst [vmem:[#allocation7] sm:$0xff] %v44_v3  ;;  %p116_p2 = scmp.ne.s32.totalorder %s54_s7, %s115_s8  ;;  %p121_p4 = scmp.lt.s32.totalorder %s115_s8, %s115_s8 }
  0x2a   :  { %47 = vst [vmem:[#allocation7 + $0x8] sm:$0xff] %v45_v5 }
  0x2b   :  { %p122_p5 = por %p121_p4, %p120_p3 }
  0x2d   :  { %p123_p6 = pnand %p122_p5, %p116_p2 }
  0x2f   :  { %126 = shalt.err (!%p123_p6)
}
  0x30   :  { %s127_s10 = scalar_lea.hbm %s210_s2, 256 }
  0x31   :  { %p128_p7 = scmp.ne.s32.totalorder %s210_s2, %s127_s10  ;;  %p131_p8 = scmp.lt.u32.totalorder %s127_s10, %s210_s2 }
  0x33   :  { %p133_p9 = pnand %p131_p8, %p128_p7 }
  0x35   :  { %136 = shalt.err (!%p133_p9)
}
  0x36   :  { %59 = dma.vmem_to_hbm [thread:$0]  %s54_s7, 256, %s210_s2, [#allocation4], %s144_s19, %s144_s19, %s145_s20  }
  0x37   :  { %141 = dma.done.wait [#allocation4], 256  }
  0x38   :  { %142 = vsyncadd [#allocation4], 4294967040 }
  0x39   :  { %63 = vsyncpa [#allocation3], 1 }
  0x3a   :  { %64 = vsyncpa [#allocation6], 1 }
  0x3b   :  { %65 = vsyncpa [#allocation4], 1 }

</bundles_post_ra>
